<compile_context>
chip_gen: v6e
topology: v6e:2x2x1
jax: 0.10.0
libtpu: 0.0.40
codegen_flags: <defaults>
</compile_context>

<pallas_src>
import functools

import numpy as np
import jax
import jax.numpy as jnp
from jax import lax
from jax.experimental import pallas as pl
from jax.experimental.pallas import tpu as pltpu


def _round_up(v, m):
    return ((v + m - 1) // m) * m


def _conv_masks(H, W):
    """(9, 1, H*W) 0/1 masks implementing the zero padding of a 3x3/pad=1 conv."""
    HW = H * W
    hh = np.arange(HW) // W
    ww = np.arange(HW) % W
    m = np.zeros((9, 1, HW), np.float32)
    for kh in range(3):
        for kw in range(3):
            dh, dw = kh - 1, kw - 1
            ok = ((hh + dh >= 0) & (hh + dh < H) &
                  (ww + dw >= 0) & (ww + dw < W))
            m[kh * 3 + kw, 0, :] = ok.astype(np.float32)
    return jnp.asarray(m)


# ---------------------------------------------------------------------------
# Fused kernel: relu(conv1(x)+b1) -> conv2(.)+b2 + 1x1 shortcut(x) -> relu
# All activations channel-major: (channels, H*W); spatial lives in lanes.
# ---------------------------------------------------------------------------
def _basic_block_kernel(x_ref, w1_ref, b1_ref, w2e_ref, b2_ref, m_ref, o_ref,
                        *, W):
    HW = x_ref.shape[-1]
    x2d = x_ref[0]                                   # (Cp, HW) channel-major

    def taps(arr):
        # Nine shifted copies of `arr` along the flattened spatial (lane)
        # axis; edge positions are zeroed by the precomputed masks (this IS
        # the conv's zero padding).  Rolls use the XLU slot, masks the VPU.
        pieces = []
        for kh in range(3):
            for kw in range(3):
                dh, dw = kh - 1, kw - 1
                d = dh * W + dw
                t = arr
                if d != 0:
                    t = pltpu.roll(t, shift=(-d) % HW, axis=1)
                if (dh, dw) != (0, 0):
                    t = t * m_ref[kh * 3 + kw]       # (1, HW) 0/1 mask
                pieces.append(t)
        return pieces

    # ---- conv1 (3x3, pad 1) + bias + relu: ONE MXU dot, K = 9*Cp ----
    xstack = jnp.concatenate(taps(x2d), axis=0)      # (9*Cp, HW)
    mid = jnp.dot(w1_ref[...], xstack, preferred_element_type=jnp.float32)
    mid = jnp.maximum(mid + b1_ref[...], 0.0)        # (Pp, HW), stays in VMEM

    # ---- conv2 (3x3) + bias + 1x1 shortcut + relu: ONE dot, K = 9*Pp+Cp ----
    mstack = jnp.concatenate(taps(mid) + [x2d], axis=0)   # (9*Pp+Cp, HW)
    out = jnp.dot(w2e_ref[...], mstack, preferred_element_type=jnp.float32)
    o_ref[0] = jnp.maximum(out + b2_ref[...], 0.0)   # lane-dense (Pp, HW) store


# ---------------------------------------------------------------------------
# Wrapper (NCHW in, NCHW out -- matches the PyTorch module)
# ---------------------------------------------------------------------------
@functools.partial(jax.jit, static_argnames=("stride", "bn"))
def basic_block_pallas(x_nchw, w1, b1, w2, b2, w_sc, *, stride=1, bn=False):
    """BasicBlock forward. x_nchw: (N, Cin, H, W) f32. Returns (N, P, H, W)."""
    assert stride == 1 and not bn   # TODO(synk): strided / bn variants
    N, Cin, H, W = x_nchw.shape
    P = w1.shape[-1]
    HW = H * W
    Cp = _round_up(Cin, 8)          # sublane-align all K blocks
    Pp = _round_up(P, 8)

    # Input: free reshape to channel-major; zero-pad channels to Cp (exact:
    # padded channels meet zero weights everywhere).
    x = x_nchw.reshape(N, Cin, HW).astype(jnp.float32)
    x = jnp.pad(x, ((0, 0), (0, Cp - Cin), (0, 0)))

    # One-time weight prep (tap-major K layout: k = (kh*3+kw)*C + c).
    w1p = jnp.pad(w1.astype(jnp.float32),
                  ((0, 0), (0, 0), (0, Cp - Cin), (0, Pp - P)))
    w1r = jnp.transpose(w1p, (3, 0, 1, 2)).reshape(Pp, 9 * Cp)

    w2p = jnp.pad(w2.astype(jnp.float32),
                  ((0, 0), (0, 0), (0, Pp - P), (0, Pp - P)))
    w2r = jnp.transpose(w2p, (3, 0, 1, 2)).reshape(Pp, 9 * Pp)

    wscp = jnp.pad(w_sc.astype(jnp.float32), ((0, Cp - Cin), (0, Pp - P)))
    w2e = jnp.concatenate([w2r, jnp.transpose(wscp)], axis=1)  # (Pp, 9*Pp+Cp)

    b1r = jnp.pad(b1.astype(jnp.float32), (0, Pp - P)).reshape(Pp, 1)
    b2r = jnp.pad(b2.astype(jnp.float32), (0, Pp - P)).reshape(Pp, 1)

    masks = _conv_masks(H, W)                                   # (9, 1, HW)

    kern = functools.partial(_basic_block_kernel, W=W)
    out = pl.pallas_call(
        kern,
        out_shape=jax.ShapeDtypeStruct((N, Pp, HW), jnp.float32),
        grid_spec=pltpu.PrefetchScalarGridSpec(
            num_scalar_prefetch=0,
            grid=(N,),
            in_specs=[
                pl.BlockSpec((1, Cp, HW), lambda n: (n, 0, 0)),
                pl.BlockSpec((Pp, 9 * Cp), lambda n: (0, 0)),
                pl.BlockSpec((Pp, 1), lambda n: (0, 0)),
                pl.BlockSpec((Pp, 9 * Pp + Cp), lambda n: (0, 0)),
                pl.BlockSpec((Pp, 1), lambda n: (0, 0)),
                pl.BlockSpec((9, 1, HW), lambda n: (0, 0, 0)),
            ],
            out_specs=pl.BlockSpec((1, Pp, HW), lambda n: (n, 0, 0)),
        ),
        compiler_params=pltpu.CompilerParams(
            dimension_semantics=("parallel",)),
    )(x, w1r, b1r, w2e, b2r, masks)

    if Pp != P:
        out = out[:, :P, :]
    return out.reshape(N, P, H, W)


# ---------------------------------------------------------------------------
# Pure-JAX reference (lax.conv) for the correctness check.
# ---------------------------------------------------------------------------
def basic_block_ref(x_nchw, w1, b1, w2, b2, w_sc):
    x = jnp.transpose(x_nchw, (0, 2, 3, 1))
    dn = ("NHWC", "HWIO", "NHWC")

    def conv3(h, w):
        return lax.conv_general_dilated(h, w, (1, 1), ((1, 1), (1, 1)),
                                        dimension_numbers=dn)

    o = jax.nn.relu(conv3(x, w1) + b1)
    o = conv3(o, w2) + b2
    sc = lax.conv_general_dilated(x, w_sc[None, None], (1, 1), "VALID",
                                  dimension_numbers=dn)
    o = jax.nn.relu(o + sc)
    return jnp.transpose(o, (0, 3, 1, 2))


if __name__ == "__main__":
    # Module hyperparameters: in_planes=4, planes=8, stride=1, bn=False
    #   -> shortcut is a 1x1 conv (in_planes != planes), conv1/conv2 have bias.
    N, Cin, H, W = 2, 4, 16, 16
    P = 8

    key = jax.random.PRNGKey(0)
    k_x, k_w1, k_b1, k_w2, k_b2, k_sc = jax.random.split(key, 6)

    x = jax.random.normal(k_x, (N, Cin, H, W), jnp.float32)

    fan1 = Cin * 9
    w1 = jax.random.uniform(k_w1, (3, 3, Cin, P), jnp.float32,
                            -1.0 / fan1 ** 0.5, 1.0 / fan1 ** 0.5)      # HWIO
    b1 = jax.random.uniform(k_b1, (P,), jnp.float32,
                            -1.0 / fan1 ** 0.5, 1.0 / fan1 ** 0.5)
    fan2 = P * 9
    w2 = jax.random.uniform(k_w2, (3, 3, P, P), jnp.float32,
                            -1.0 / fan2 ** 0.5, 1.0 / fan2 ** 0.5)
    b2 = jax.random.uniform(k_b2, (P,), jnp.float32,
                            -1.0 / fan2 ** 0.5, 1.0 / fan2 ** 0.5)
    w_sc = jax.random.uniform(k_sc, (Cin, P), jnp.float32,
                              -1.0 / Cin ** 0.5, 1.0 / Cin ** 0.5)      # 1x1 conv

    out = basic_block_pallas(x, w1, b1, w2, b2, w_sc)
    out = jax.block_until_ready(out)

    ref = jax.block_until_ready(basic_block_ref(x, w1, b1, w2, b2, w_sc))
    assert out.shape == (N, P, H, W)
    assert jnp.allclose(out, ref, atol=1e-4, rtol=1e-4), \
        f"max abs err {jnp.max(jnp.abs(out - ref))}"

    print("KERNEL_OK")
</pallas_src>

<mosaic_0001>
module attributes {stable_mosaic.version = 11 : i64} {
  func.func @_basic_block_kernel(%arg0: i32, %arg1: memref<1x8x256xf32, #tpu.memory_space<vmem>>, %arg2: memref<8x72xf32, #tpu.memory_space<vmem>>, %arg3: memref<8x1xf32, #tpu.memory_space<vmem>>, %arg4: memref<8x80xf32, #tpu.memory_space<vmem>>, %arg5: memref<8x1xf32, #tpu.memory_space<vmem>>, %arg6: memref<9x1x256xf32, #tpu.memory_space<vmem>>, %arg7: memref<1x8x256xf32, #tpu.memory_space<vmem>>) attributes {dimension_semantics = [#tpu.dimension_semantics<parallel>], iteration_bounds = array<i64: 2>, scalar_prefetch = 0 : i64, scratch_operands = 0 : i64, tpu.core_type = #tpu.core_type<tc>, window_params = [{transform_indices = @transform_0, window_bounds = array<i64: 1, 8, 256>}, {pipeline_mode = #tpu.pipeline_mode<synchronous>, transform_indices = @transform_1, window_bounds = array<i64: 8, 72>}, {pipeline_mode = #tpu.pipeline_mode<synchronous>, transform_indices = @transform_2, window_bounds = array<i64: 8, 1>}, {pipeline_mode = #tpu.pipeline_mode<synchronous>, transform_indices = @transform_3, window_bounds = array<i64: 8, 80>}, {pipeline_mode = #tpu.pipeline_mode<synchronous>, transform_indices = @transform_4, window_bounds = array<i64: 8, 1>}, {pipeline_mode = #tpu.pipeline_mode<synchronous>, transform_indices = @transform_5, window_bounds = array<i64: 9, 1, 256>}, {transform_indices = @transform_6, window_bounds = array<i64: 1, 8, 256>}]} {
    %c0 = arith.constant 0 : index
    %c0_0 = arith.constant 0 : index
    %c0_1 = arith.constant 0 : index
    %0 = vector.load %arg1[%c0, %c0_0, %c0_1] : memref<1x8x256xf32, #tpu.memory_space<vmem>>, vector<1x8x256xf32>
    %1 = vector.shape_cast %0 : vector<1x8x256xf32> to vector<8x256xf32>
    %c17_i32 = arith.constant 17 : i32
    %2 = tpu.dynamic_rotate %1 by %c17_i32 dim 1 : vector<8x256xf32>, i32 -> vector<8x256xf32>
    %c0_2 = arith.constant 0 : index
    %c0_3 = arith.constant 0 : index
    %c0_4 = arith.constant 0 : index
    %3 = vector.load %arg6[%c0_2, %c0_3, %c0_4] : memref<9x1x256xf32, #tpu.memory_space<vmem>>, vector<1x1x256xf32>
    %4 = vector.shape_cast %3 : vector<1x1x256xf32> to vector<1x256xf32>
    %5 = vector.broadcast %4 : vector<1x256xf32> to vector<8x256xf32>
    %6 = arith.mulf %2, %5 : vector<8x256xf32>
    %c16_i32 = arith.constant 16 : i32
    %7 = tpu.dynamic_rotate %1 by %c16_i32 dim 1 : vector<8x256xf32>, i32 -> vector<8x256xf32>
    %c1 = arith.constant 1 : index
    %c0_5 = arith.constant 0 : index
    %c0_6 = arith.constant 0 : index
    %8 = vector.load %arg6[%c1, %c0_5, %c0_6] : memref<9x1x256xf32, #tpu.memory_space<vmem>>, vector<1x1x256xf32>
    %9 = vector.shape_cast %8 : vector<1x1x256xf32> to vector<1x256xf32>
    %10 = vector.broadcast %9 : vector<1x256xf32> to vector<8x256xf32>
    %11 = arith.mulf %7, %10 : vector<8x256xf32>
    %c15_i32 = arith.constant 15 : i32
    %12 = tpu.dynamic_rotate %1 by %c15_i32 dim 1 : vector<8x256xf32>, i32 -> vector<8x256xf32>
    %c2 = arith.constant 2 : index
    %c0_7 = arith.constant 0 : index
    %c0_8 = arith.constant 0 : index
    %13 = vector.load %arg6[%c2, %c0_7, %c0_8] : memref<9x1x256xf32, #tpu.memory_space<vmem>>, vector<1x1x256xf32>
    %14 = vector.shape_cast %13 : vector<1x1x256xf32> to vector<1x256xf32>
    %15 = vector.broadcast %14 : vector<1x256xf32> to vector<8x256xf32>
    %16 = arith.mulf %12, %15 : vector<8x256xf32>
    %c1_i32 = arith.constant 1 : i32
    %17 = tpu.dynamic_rotate %1 by %c1_i32 dim 1 : vector<8x256xf32>, i32 -> vector<8x256xf32>
    %c3 = arith.constant 3 : index
    %c0_9 = arith.constant 0 : index
    %c0_10 = arith.constant 0 : index
    %18 = vector.load %arg6[%c3, %c0_9, %c0_10] : memref<9x1x256xf32, #tpu.memory_space<vmem>>, vector<1x1x256xf32>
    %19 = vector.shape_cast %18 : vector<1x1x256xf32> to vector<1x256xf32>
    %20 = vector.broadcast %19 : vector<1x256xf32> to vector<8x256xf32>
    %21 = arith.mulf %17, %20 : vector<8x256xf32>
    %c255_i32 = arith.constant 255 : i32
    %22 = tpu.dynamic_rotate %1 by %c255_i32 dim 1 : vector<8x256xf32>, i32 -> vector<8x256xf32>
    %c5 = arith.constant 5 : index
    %c0_11 = arith.constant 0 : index
    %c0_12 = arith.constant 0 : index
    %23 = vector.load %arg6[%c5, %c0_11, %c0_12] : memref<9x1x256xf32, #tpu.memory_space<vmem>>, vector<1x1x256xf32>
    %24 = vector.shape_cast %23 : vector<1x1x256xf32> to vector<1x256xf32>
    %25 = vector.broadcast %24 : vector<1x256xf32> to vector<8x256xf32>
    %26 = arith.mulf %22, %25 : vector<8x256xf32>
    %c241_i32 = arith.constant 241 : i32
    %27 = tpu.dynamic_rotate %1 by %c241_i32 dim 1 : vector<8x256xf32>, i32 -> vector<8x256xf32>
    %c6 = arith.constant 6 : index
    %c0_13 = arith.constant 0 : index
    %c0_14 = arith.constant 0 : index
    %28 = vector.load %arg6[%c6, %c0_13, %c0_14] : memref<9x1x256xf32, #tpu.memory_space<vmem>>, vector<1x1x256xf32>
    %29 = vector.shape_cast %28 : vector<1x1x256xf32> to vector<1x256xf32>
    %30 = vector.broadcast %29 : vector<1x256xf32> to vector<8x256xf32>
    %31 = arith.mulf %27, %30 : vector<8x256xf32>
    %c240_i32 = arith.constant 240 : i32
    %32 = tpu.dynamic_rotate %1 by %c240_i32 dim 1 : vector<8x256xf32>, i32 -> vector<8x256xf32>
    %c7 = arith.constant 7 : index
    %c0_15 = arith.constant 0 : index
    %c0_16 = arith.constant 0 : index
    %33 = vector.load %arg6[%c7, %c0_15, %c0_16] : memref<9x1x256xf32, #tpu.memory_space<vmem>>, vector<1x1x256xf32>
    %34 = vector.shape_cast %33 : vector<1x1x256xf32> to vector<1x256xf32>
    %35 = vector.broadcast %34 : vector<1x256xf32> to vector<8x256xf32>
    %36 = arith.mulf %32, %35 : vector<8x256xf32>
    %c239_i32 = arith.constant 239 : i32
    %37 = tpu.dynamic_rotate %1 by %c239_i32 dim 1 : vector<8x256xf32>, i32 -> vector<8x256xf32>
    %c8 = arith.constant 8 : index
    %c0_17 = arith.constant 0 : index
    %c0_18 = arith.constant 0 : index
    %38 = vector.load %arg6[%c8, %c0_17, %c0_18] : memref<9x1x256xf32, #tpu.memory_space<vmem>>, vector<1x1x256xf32>
    %39 = vector.shape_cast %38 : vector<1x1x256xf32> to vector<1x256xf32>
    %40 = vector.broadcast %39 : vector<1x256xf32> to vector<8x256xf32>
    %41 = arith.mulf %37, %40 : vector<8x256xf32>
    %42 = tpu.concatenate %6, %11, %16, %21, %1, %26, %31, %36, %41 in 0 : vector<8x256xf32>, vector<8x256xf32>, vector<8x256xf32>, vector<8x256xf32>, vector<8x256xf32>, vector<8x256xf32>, vector<8x256xf32>, vector<8x256xf32>, vector<8x256xf32> -> vector<72x256xf32>
    %c0_19 = arith.constant 0 : index
    %c0_20 = arith.constant 0 : index
    %43 = vector.load %arg2[%c0_19, %c0_20] : memref<8x72xf32, #tpu.memory_space<vmem>>, vector<8x72xf32>
    %cst = arith.constant dense<0.000000e+00> : vector<8x256xf32>
    %44 = tpu.matmul %43, %42, %cst {dimension_numbers = #tpu.dot_dimension_numbers<[1], [0], [0], [1], [0, 0, 1, 1], [], []>} : vector<8x72xf32>, vector<72x256xf32>, vector<8x256xf32> -> vector<8x256xf32>
    %c0_21 = arith.constant 0 : index
    %c0_22 = arith.constant 0 : index
    %45 = vector.load %arg3[%c0_21, %c0_22] : memref<8x1xf32, #tpu.memory_space<vmem>>, vector<8x1xf32>
    %46 = vector.broadcast %45 : vector<8x1xf32> to vector<8x256xf32>
    %47 = arith.addf %44, %46 : vector<8x256xf32>
    %cst_23 = arith.constant 0.000000e+00 : f32
    %48 = vector.broadcast %cst_23 : f32 to vector<8x256xf32>
    %49 = arith.maximumf %47, %48 : vector<8x256xf32>
    %c17_i32_24 = arith.constant 17 : i32
    %50 = tpu.dynamic_rotate %49 by %c17_i32_24 dim 1 : vector<8x256xf32>, i32 -> vector<8x256xf32>
    %c0_25 = arith.constant 0 : index
    %c0_26 = arith.constant 0 : index
    %c0_27 = arith.constant 0 : index
    %51 = vector.load %arg6[%c0_25, %c0_26, %c0_27] : memref<9x1x256xf32, #tpu.memory_space<vmem>>, vector<1x1x256xf32>
    %52 = vector.shape_cast %51 : vector<1x1x256xf32> to vector<1x256xf32>
    %53 = vector.broadcast %52 : vector<1x256xf32> to vector<8x256xf32>
    %54 = arith.mulf %50, %53 : vector<8x256xf32>
    %c16_i32_28 = arith.constant 16 : i32
    %55 = tpu.dynamic_rotate %49 by %c16_i32_28 dim 1 : vector<8x256xf32>, i32 -> vector<8x256xf32>
    %c1_29 = arith.constant 1 : index
    %c0_30 = arith.constant 0 : index
    %c0_31 = arith.constant 0 : index
    %56 = vector.load %arg6[%c1_29, %c0_30, %c0_31] : memref<9x1x256xf32, #tpu.memory_space<vmem>>, vector<1x1x256xf32>
    %57 = vector.shape_cast %56 : vector<1x1x256xf32> to vector<1x256xf32>
    %58 = vector.broadcast %57 : vector<1x256xf32> to vector<8x256xf32>
    %59 = arith.mulf %55, %58 : vector<8x256xf32>
    %c15_i32_32 = arith.constant 15 : i32
    %60 = tpu.dynamic_rotate %49 by %c15_i32_32 dim 1 : vector<8x256xf32>, i32 -> vector<8x256xf32>
    %c2_33 = arith.constant 2 : index
    %c0_34 = arith.constant 0 : index
    %c0_35 = arith.constant 0 : index
    %61 = vector.load %arg6[%c2_33, %c0_34, %c0_35] : memref<9x1x256xf32, #tpu.memory_space<vmem>>, vector<1x1x256xf32>
    %62 = vector.shape_cast %61 : vector<1x1x256xf32> to vector<1x256xf32>
    %63 = vector.broadcast %62 : vector<1x256xf32> to vector<8x256xf32>
    %64 = arith.mulf %60, %63 : vector<8x256xf32>
    %c1_i32_36 = arith.constant 1 : i32
    %65 = tpu.dynamic_rotate %49 by %c1_i32_36 dim 1 : vector<8x256xf32>, i32 -> vector<8x256xf32>
    %c3_37 = arith.constant 3 : index
    %c0_38 = arith.constant 0 : index
    %c0_39 = arith.constant 0 : index
    %66 = vector.load %arg6[%c3_37, %c0_38, %c0_39] : memref<9x1x256xf32, #tpu.memory_space<vmem>>, vector<1x1x256xf32>
    %67 = vector.shape_cast %66 : vector<1x1x256xf32> to vector<1x256xf32>
    %68 = vector.broadcast %67 : vector<1x256xf32> to vector<8x256xf32>
    %69 = arith.mulf %65, %68 : vector<8x256xf32>
    %c255_i32_40 = arith.constant 255 : i32
    %70 = tpu.dynamic_rotate %49 by %c255_i32_40 dim 1 : vector<8x256xf32>, i32 -> vector<8x256xf32>
    %c5_41 = arith.constant 5 : index
    %c0_42 = arith.constant 0 : index
    %c0_43 = arith.constant 0 : index
    %71 = vector.load %arg6[%c5_41, %c0_42, %c0_43] : memref<9x1x256xf32, #tpu.memory_space<vmem>>, vector<1x1x256xf32>
    %72 = vector.shape_cast %71 : vector<1x1x256xf32> to vector<1x256xf32>
    %73 = vector.broadcast %72 : vector<1x256xf32> to vector<8x256xf32>
    %74 = arith.mulf %70, %73 : vector<8x256xf32>
    %c241_i32_44 = arith.constant 241 : i32
    %75 = tpu.dynamic_rotate %49 by %c241_i32_44 dim 1 : vector<8x256xf32>, i32 -> vector<8x256xf32>
    %c6_45 = arith.constant 6 : index
    %c0_46 = arith.constant 0 : index
    %c0_47 = arith.constant 0 : index
    %76 = vector.load %arg6[%c6_45, %c0_46, %c0_47] : memref<9x1x256xf32, #tpu.memory_space<vmem>>, vector<1x1x256xf32>
    %77 = vector.shape_cast %76 : vector<1x1x256xf32> to vector<1x256xf32>
    %78 = vector.broadcast %77 : vector<1x256xf32> to vector<8x256xf32>
    %79 = arith.mulf %75, %78 : vector<8x256xf32>
    %c240_i32_48 = arith.constant 240 : i32
    %80 = tpu.dynamic_rotate %49 by %c240_i32_48 dim 1 : vector<8x256xf32>, i32 -> vector<8x256xf32>
    %c7_49 = arith.constant 7 : index
    %c0_50 = arith.constant 0 : index
    %c0_51 = arith.constant 0 : index
    %81 = vector.load %arg6[%c7_49, %c0_50, %c0_51] : memref<9x1x256xf32, #tpu.memory_space<vmem>>, vector<1x1x256xf32>
    %82 = vector.shape_cast %81 : vector<1x1x256xf32> to vector<1x256xf32>
    %83 = vector.broadcast %82 : vector<1x256xf32> to vector<8x256xf32>
    %84 = arith.mulf %80, %83 : vector<8x256xf32>
    %c239_i32_52 = arith.constant 239 : i32
    %85 = tpu.dynamic_rotate %49 by %c239_i32_52 dim 1 : vector<8x256xf32>, i32 -> vector<8x256xf32>
    %c8_53 = arith.constant 8 : index
    %c0_54 = arith.constant 0 : index
    %c0_55 = arith.constant 0 : index
    %86 = vector.load %arg6[%c8_53, %c0_54, %c0_55] : memref<9x1x256xf32, #tpu.memory_space<vmem>>, vector<1x1x256xf32>
    %87 = vector.shape_cast %86 : vector<1x1x256xf32> to vector<1x256xf32>
    %88 = vector.broadcast %87 : vector<1x256xf32> to vector<8x256xf32>
    %89 = arith.mulf %85, %88 : vector<8x256xf32>
    %90 = tpu.concatenate %54, %59, %64, %69, %49, %74, %79, %84, %89, %1 in 0 : vector<8x256xf32>, vector<8x256xf32>, vector<8x256xf32>, vector<8x256xf32>, vector<8x256xf32>, vector<8x256xf32>, vector<8x256xf32>, vector<8x256xf32>, vector<8x256xf32>, vector<8x256xf32> -> vector<80x256xf32>
    %c0_56 = arith.constant 0 : index
    %c0_57 = arith.constant 0 : index
    %91 = vector.load %arg4[%c0_56, %c0_57] : memref<8x80xf32, #tpu.memory_space<vmem>>, vector<8x80xf32>
    %cst_58 = arith.constant dense<0.000000e+00> : vector<8x256xf32>
    %92 = tpu.matmul %91, %90, %cst_58 {dimension_numbers = #tpu.dot_dimension_numbers<[1], [0], [0], [1], [0, 0, 1, 1], [], []>} : vector<8x80xf32>, vector<80x256xf32>, vector<8x256xf32> -> vector<8x256xf32>
    %c0_59 = arith.constant 0 : index
    %c0_60 = arith.constant 0 : index
    %93 = vector.load %arg5[%c0_59, %c0_60] : memref<8x1xf32, #tpu.memory_space<vmem>>, vector<8x1xf32>
    %94 = vector.broadcast %93 : vector<8x1xf32> to vector<8x256xf32>
    %95 = arith.addf %92, %94 : vector<8x256xf32>
    %cst_61 = arith.constant 0.000000e+00 : f32
    %96 = vector.broadcast %cst_61 : f32 to vector<8x256xf32>
    %97 = arith.maximumf %95, %96 : vector<8x256xf32>
    %c0_62 = arith.constant 0 : index
    %c0_63 = arith.constant 0 : index
    %c0_64 = arith.constant 0 : index
    %98 = vector.load %arg7[%c0_62, %c0_63, %c0_64] : memref<1x8x256xf32, #tpu.memory_space<vmem>>, vector<1x8x256xf32>
    %99 = vector.shape_cast %98 : vector<1x8x256xf32> to vector<8x256xf32>
    %100 = vector.shape_cast %97 : vector<8x256xf32> to vector<1x8x256xf32>
    tpu.vector_store %arg7[%c0_62, %c0_63, %c0_64], %100 {strides = array<i32>} : memref<1x8x256xf32, #tpu.memory_space<vmem>>, vector<1x8x256xf32>,
    return
  }
  func.func @transform_0(%arg0: i32) -> (i32, i32, i32) {
    %c0_i32 = arith.constant 0 : i32
    %c0_i32_0 = arith.constant 0 : i32
    %c0_i32_1 = arith.constant 0 : i32
    return %arg0, %c0_i32, %c0_i32_0 : i32, i32, i32
  }
  func.func @transform_1(%arg0: i32) -> (i32, i32) {
    %c0_i32 = arith.constant 0 : i32
    %c0_i32_0 = arith.constant 0 : i32
    %c0_i32_1 = arith.constant 0 : i32
    return %c0_i32, %c0_i32_0 : i32, i32
  }
  func.func @transform_2(%arg0: i32) -> (i32, i32) {
    %c0_i32 = arith.constant 0 : i32
    %c0_i32_0 = arith.constant 0 : i32
    %c0_i32_1 = arith.constant 0 : i32
    return %c0_i32, %c0_i32_0 : i32, i32
  }
  func.func @transform_3(%arg0: i32) -> (i32, i32) {
    %c0_i32 = arith.constant 0 : i32
    %c0_i32_0 = arith.constant 0 : i32
    %c0_i32_1 = arith.constant 0 : i32
    return %c0_i32, %c0_i32_0 : i32, i32
  }
  func.func @transform_4(%arg0: i32) -> (i32, i32) {
    %c0_i32 = arith.constant 0 : i32
    %c0_i32_0 = arith.constant 0 : i32
    %c0_i32_1 = arith.constant 0 : i32
    return %c0_i32, %c0_i32_0 : i32, i32
  }
  func.func @transform_5(%arg0: i32) -> (i32, i32, i32) {
    %c0_i32 = arith.constant 0 : i32
    %c0_i32_0 = arith.constant 0 : i32
    %c0_i32_1 = arith.constant 0 : i32
    %c0_i32_2 = arith.constant 0 : i32
    return %c0_i32, %c0_i32_0, %c0_i32_1 : i32, i32, i32
  }
  func.func @transform_6(%arg0: i32) -> (i32, i32, i32) {
    %c0_i32 = arith.constant 0 : i32
    %c0_i32_0 = arith.constant 0 : i32
    %c0_i32_1 = arith.constant 0 : i32
    return %arg0, %c0_i32, %c0_i32_0 : i32, i32, i32
  }
}

</mosaic_0001>

<bundles_post_ra>
// kernel: basic_block_pallas.1
= control target key start
LH: loop header
LB: loop body
LE: loop exit
PB: predicated region body
PF: predicated region fallthrough
CT: control target
= control target key end

     0   :  { %s814_s21 = smov 0   ;;  %s1088_s0 = inlined_call_operand.vmem [shape: f32[2,8,256], index: 0, kind: input, shape index: {}]   ;;  %s1089_s1 = inlined_call_operand.vmem [shape: f32[8,72], index: 1, kind: input, shape index: {}]   ;;  %s1090_s2 = inlined_call_operand.vmem [shape: f32[8,1], index: 2, kind: input, shape index: {}]   ;;  %s1091_s3 = inlined_call_operand.vmem [shape: f32[8,80], index: 3, kind: input, shape index: {}]   ;;  %s1092_s4 = inlined_call_operand.vmem [shape: f32[8,1], index: 4, kind: input, shape index: {}]   ;;  %s1093_s5 = inlined_call_operand.vmem [shape: f32[9,1,256], index: 5, kind: input, shape index: {}]   ;;  %s1094_s6 = inlined_call_operand.vmem [shape: f32[2,8,256], index: 6, kind: output, shape index: {}]  }
   0x1 LB: > { %s720_s22 = sadd.s32 4294967295, %s767_s21   ;;  %p724_p0 = scmp.ge.s32.totalorder %s767_s21, 1  ;;  %s767_s21 = sphi %s814_s21, %s16_s21  }
   0x2   : > { %p212_p1 = scmp.lt.s32.totalorder %s767_s21, 3 }
   0x4   : > { %p213_p2 = pnand %p724_p0, %p212_p1 }
   0x5   : > { %p242_p3 = scmp.lt.s32.totalorder (!%p213_p2), %s720_s22, 1  ;;  %s769_s27 = smov (!%p213_p2), 112  }
   0x6   : > { %216 = sbr.rel (%p213_p2) target bundleno = 712 (0x2c8), region = 44  ;;  %s770_s28 = smov (!%p213_p2), 111  }
   0x7   : > { %s771_s29 = smov (!%p213_p2), 113   ;;  %s772_s30 = smov (!%p213_p2), 127  }
   0x8   : > { %s773_s7 = smov (!%p213_p2), 1   ;;  %s775_s8 = smov (!%p213_p2), 15  }
   0x9   : > { %s777_s9 = smov (!%p213_p2), 16   ;;  %s778_s10 = smov (!%p213_p2), 17  }
   0xb   : > { %s1096_s22 = smov (!%p242_p3, %s720_s22), 1  ;;  %v774_v2 = vmov 0.0   ;;  %v776_v3 = vmov 0   ;;  %v432_v4 = vld [vmem:[%s1090_s2] sm:$0xff]  ;;  %v258_v5 = vlaneseq  ;;  %v735_v10 = vld [vmem:[%s1093_s5 + $0x10] sm:$0x3] }
   0xc   : > { %s740_s23 = sshll.u32 %s1096_s22, 4  ;;  %506 = vmatprep.mubr.f32.mxu0 %v774_v2  ;;  %654 = vmatprep.mubr.f32.mxu1 %v774_v2  ;;  %v734_v13 = vld [vmem:[%s1093_s5 + $0xe] sm:$0x3]  ;;  %v733_v15 = vld [vmem:[%s1093_s5 + $0xc] sm:$0x3]  ;;  %vm438_vm8 = vcmask 588800  }
   0xd   : > { %s246_s26 = scalar_lea.vmem %s1088_s0, %s740_s23  ;;  %760 = vset.pattern.permute.xlu0 %v776_v3  ;;  %v266_v6 = vshrl.u32 %v258_v5, 7  ;;  %v871_v7 = vand.u32 127, %v258_v5  ;;  %v732_v29 = vld [vmem:[%s1093_s5 + $0xa] sm:$0x3]  ;;  %v731_v40 = vld [vmem:[%s1093_s5 + $0x6] sm:$0x3] }
   0xe   : > { %v830_v0 = vld [vmem:[%s246_s26] sm:$0xff]  ;;  %v836_v1 = vld [vmem:[%s246_s26 + $0x8] sm:$0xff]  ;;  %vm586_vm9 = vcmask 654336  }
   0xf   : > { %387 = vrot.lane.b32.xlu1 %v830_v0, %s769_s27  ;;  %409 = vrot.lane.b32.xlu0 %v830_v0, %s770_s28  ;;  %v873_v8 = vsub.s32 0, %v266_v6  ;;  %v875_v9 = vsub.s32 1, %v266_v6  ;;  %vm391_vm0 = vcmp.lt.s32.totalorder %v871_v7, 112  ;;  %vm413_vm1 = vcmp.lt.s32.totalorder %v871_v7, 111  ;;  %v730_v49 = vld [vmem:[%s1093_s5 + $0x4] sm:$0x3] }
  0x10   : > { %602 = vmatprep.subr.mxu1 %v836_v1  ;;  %vm369_vm2 = vcmp.lt.s32.totalorder %v871_v7, 113  ;;  %vm347_vm3 = vcmp.lt.s32.totalorder %v871_v7, 127  ;;  %vm325_vm4 = vcmp.lt.s32.totalorder %v871_v7, 1  ;;  %vm303_vm5 = vcmp.lt.s32.totalorder %v871_v7, 15  ;;  %v729_v58 = vld [vmem:[%s1093_s5 + $0x2] sm:$0x3] }
  0x11   : > { %603 = vmatpush1.msra.mxu1 %v830_v0  ;;  %v886_v14 = vrot.slane %v735_v10, %v875_v9  ;;  %v892_v16 = vrot.slane %v735_v10, %v873_v8  ;;  %v895_v17 = vrot.slane %v734_v13, %v873_v8  ;;  %v898_v18 = vrot.slane %v734_v13, %v875_v9  ;;  %v263_v3 = vld [vmem:[%s1093_s5] sm:$0x3] }
  0x12   : > { %v908_v24 = vrot.slane %v733_v15, %v873_v8  ;;  %v914_v27 = vrot.slane %v733_v15, %v875_v9  ;;  %v930_v38 = vrot.slane %v732_v29, %v873_v8  ;;  %v933_v39 = vrot.slane %v732_v29, %v875_v9 }
  0x13   : > { %389 = vrot.lane.b32.xlu1 %v836_v1, %s769_s27  ;;  %411 = vrot.lane.b32.xlu0 %v836_v1, %s770_s28  ;;  %v946_v47 = vrot.slane %v731_v40, %v873_v8  ;;  %v949_v48 = vrot.slane %v731_v40, %v875_v9  ;;  %v963_v56 = vrot.slane %v730_v49, %v873_v8  ;;  %vm281_vm6 = vcmp.lt.s32.totalorder %v871_v7, 16 }
  0x14   : > { %v966_v57 = vrot.slane %v730_v49, %v875_v9  ;;  %v983_v2 = vrot.slane %v729_v58, %v875_v9  ;;  %vm260_vm7 = vcmp.lt.s32.totalorder %v871_v7, 17  ;;  %v996_v13 = vrot.slane %v263_v3, %v873_v8 }
  0x15   : > { %v999_v15 = vrot.slane %v263_v3, %v875_v9 }
  0x17   : > { %367 = vrot.lane.b32.xlu1 %v836_v1, %s771_s29  ;;  %365 = vrot.lane.b32.xlu0 %v830_v0, %s771_s29 }
  0x1b   : > { %345 = vrot.lane.b32.xlu1 %v836_v1, %s772_s30  ;;  %343 = vrot.lane.b32.xlu0 %v830_v0, %s772_s30 }
  0x1f   : > { %323 = vrot.lane.b32.xlu1 %v836_v1, %s773_s7  ;;  %321 = vrot.lane.b32.xlu0 %v830_v0, %s773_s7 }
  0x23   : > { %301 = vrot.lane.b32.xlu1 %v836_v1, %s775_s8  ;;  %299 = vrot.lane.b32.xlu0 %v830_v0, %s775_s8 }
  0x27   : > { %279 = vrot.lane.b32.xlu1 %v836_v1, %s777_s9  ;;  %277 = vrot.lane.b32.xlu0 %v830_v0, %s777_s9 }
  0x2b   : > { %256 = vrot.lane.b32.xlu1 %v836_v1, %s778_s10  ;;  %254 = vrot.lane.b32.xlu0 %v830_v0, %s778_s10 }
  0x2f   : > { %435 = vperm.xlu0 %760, %v432_v4  }
  0x81   : > { %v388_v11 = vpop.permute.xlu1 %387  ;;  %v410_v12 = vpop.permute.xlu0 %409 }
  0x85   : > { %v390_v19 = vpop.permute.xlu1 %389  ;;  %v412_v20 = vpop.permute.xlu0 %411 }
  0x86   : > { %v393_v21 = vsel %vm391_vm0, %v390_v19, %v388_v11  ;;  %v414_v22 = vsel %vm413_vm1, %v410_v12, %v412_v20  ;;  %v415_v23 = vsel %vm413_vm1, %v412_v20, %v410_v12  ;;  %v392_v25 = vsel %vm391_vm0, %v388_v11, %v390_v19 }
  0x87   : > { %v430_v26 = vmul.f32 %v886_v14, %v415_v23  ;;  %v429_v28 = vmul.f32 %v892_v16, %v414_v22  ;;  %v408_v30 = vmul.f32 %v898_v18, %v393_v21  ;;  %v407_v33 = vmul.f32 %v895_v17, %v392_v25 }
  0x89   : > { %v368_v31 = vpop.permute.xlu1 %367  ;;  %456 = vmatprep.subr.mxu0 %v430_v26  ;;  %v366_v32 = vpop.permute.xlu0 %365 }
  0x8a   : > { %v370_v34 = vsel %vm369_vm2, %v366_v32, %v368_v31  ;;  %v371_v35 = vsel %vm369_vm2, %v368_v31, %v366_v32  ;;  %457 = vmatpush1.msra.mxu0 %v429_v28 }
  0x8b   : > { %v385_v36 = vmul.f32 %v908_v24, %v370_v34  ;;  %v386_v37 = vmul.f32 %v914_v27, %v371_v35  ;;  %458 = vmatprep.subr.mxu0 %v408_v30 }
  0x8c   : > { %459 = vmatpush1.msra.mxu0 %v407_v33  ;;  %v580_v33 = vld [vmem:[%s1092_s4] sm:$0xff] }
  0x8d   : > { %v346_v41 = vpop.permute.xlu1 %345  ;;  %460 = vmatprep.subr.mxu0 %v386_v37  ;;  %v344_v42 = vpop.permute.xlu0 %343 }
  0x8e   : > { %v348_v43 = vsel %vm347_vm3, %v344_v42, %v346_v41  ;;  %v349_v44 = vsel %vm347_vm3, %v346_v41, %v344_v42  ;;  %461 = vmatpush1.msra.mxu0 %v385_v36 }
  0x8f   : > { %v363_v45 = vmul.f32 %v930_v38, %v348_v43  ;;  %v364_v46 = vmul.f32 %v933_v39, %v349_v44 }
  0x91   : > { %v324_v50 = vpop.permute.xlu1 %323  ;;  %462 = vmatprep.subr.mxu0 %v364_v46  ;;  %v322_v51 = vpop.permute.xlu0 %321 }
  0x92   : > { %v326_v52 = vsel %vm325_vm4, %v322_v51, %v324_v50  ;;  %v327_v53 = vsel %vm325_vm4, %v324_v50, %v322_v51  ;;  %463 = vmatpush1.msra.mxu0 %v363_v45 }
  0x93   : > { %v341_v54 = vmul.f32 %v946_v47, %v327_v53  ;;  %v342_v55 = vmul.f32 %v949_v48, %v326_v52  ;;  %464 = vmatprep.subr.mxu0 %v836_v1  ;;  %v980_v1 = vrot.slane %v729_v58, %v873_v8  ;;  %v431_v8 = vld [vmem:[%s1089_s1] sm:$0xff] }
  0x94   : > { %465 = vmatpush1.msra.mxu0 %v830_v0 }
  0x95   : > { %v302_v59 = vpop.permute.xlu1 %301  ;;  %466 = vmatprep.subr.mxu0 %v342_v55  ;;  %v300_v60 = vpop.permute.xlu0 %299 }
  0x96   : > { %v304_v61 = vsel %vm303_vm5, %v300_v60, %v302_v59  ;;  %v305_v62 = vsel %vm303_vm5, %v302_v59, %v300_v60  ;;  %467 = vmatpush1.msra.mxu0 %v341_v54 }
  0x97   : > { %v319_v63 = vmul.f32 %v963_v56, %v305_v62  ;;  %v320_v0 = vmul.f32 %v966_v57, %v304_v61 }
  0x99   : > { %v280_v4 = vpop.permute.xlu1 %279  ;;  %468 = vmatprep.subr.mxu0 %v320_v0  ;;  %v278_v5 = vpop.permute.xlu0 %277 }
  0x9a   : > { %v282_v6 = vsel %vm281_vm6, %v278_v5, %v280_v4  ;;  %v283_v10 = vsel %vm281_vm6, %v280_v4, %v278_v5  ;;  %469 = vmatpush1.msra.mxu0 %v319_v63 }
  0x9b   : > { %v297_v11 = vmul.f32 %v980_v1, %v283_v10  ;;  %v298_v12 = vmul.f32 %v983_v2, %v282_v6 }
  0x9d   : > { %v257_v19 = vpop.permute.xlu1 %256  ;;  %470 = vmatprep.subr.mxu0 %v298_v12  ;;  %v255_v20 = vpop.permute.xlu0 %254 }
  0x9e   : > { %v261_v21 = vsel %vm260_vm7, %v255_v20, %v257_v19  ;;  %v262_v22 = vsel %vm260_vm7, %v257_v19, %v255_v20  ;;  %471 = vmatpush1.msra.mxu0 %v297_v11 }
  0x9f   : > { %v275_v23 = vmul.f32 %v996_v13, %v262_v22  ;;  %v276_v25 = vmul.f32 %v999_v15, %v261_v21 }
  0xa1   : > { %472 = vmatprep.subr.mxu0 %v276_v25 }
  0xa2   : > { %473 = vmatpush1.msra.mxu0 %v275_v23 }
  0xa3   : > { %736 = vmatmul.mubr.msk.f32.vlgmr.msra.gmra.mxu0 %vm438_vm8, %v431_v8 }
  0xaa   : > { %v436_v9 = vpop.permute.xlu0 %435 }
 0x163   : > { %v508_v26 = vpop.f32.mrf.mxu0 }
 0x164   : > { %v509_v28 = vadd.f32 %v508_v26, %v436_v9 }
 0x165   : > { %v510_v29 = vpop.f32.mrf.mxu0 }
 0x166   : > { %v513_v30 = vmax.f32 %v509_v28, 0.0  ;;  %v511_v31 = vadd.f32 %v510_v29, %v436_v9 }
 0x168   : > { %563 = vrot.lane.b32.xlu0 %v513_v30, %s769_s27  ;;  %571 = vrot.lane.b32.xlu1 %v513_v30, %s770_s28  ;;  %v514_v32 = vmax.f32 %v511_v31, 0.0 }
 0x16c   : > { %555 = vrot.lane.b32.xlu0 %v513_v30, %s771_s29  ;;  %573 = vrot.lane.b32.xlu1 %v514_v32, %s770_s28 }
 0x170   : > { %547 = vrot.lane.b32.xlu0 %v513_v30, %s772_s30  ;;  %565 = vrot.lane.b32.xlu1 %v514_v32, %s769_s27 }
 0x174   : > { %539 = vrot.lane.b32.xlu0 %v513_v30, %s773_s7  ;;  %557 = vrot.lane.b32.xlu1 %v514_v32, %s771_s29 }
 0x178   : > { %531 = vrot.lane.b32.xlu0 %v513_v30, %s775_s8  ;;  %549 = vrot.lane.b32.xlu1 %v514_v32, %s772_s30 }
 0x17c   : > { %523 = vrot.lane.b32.xlu0 %v513_v30, %s777_s9  ;;  %541 = vrot.lane.b32.xlu1 %v514_v32, %s773_s7 }
 0x180   : > { %515 = vrot.lane.b32.xlu0 %v513_v30, %s778_s10  ;;  %533 = vrot.lane.b32.xlu1 %v514_v32, %s775_s8  ;;  %s251_s8 = scalar_lea.vmem %s1094_s6, %s740_s23 }
 0x184   : > { %583 = vperm.xlu0 %760, %v580_v33   ;;  %525 = vrot.lane.b32.xlu1 %v514_v32, %s777_s9 }
 0x188   : > { %517 = vrot.lane.b32.xlu1 %v514_v32, %s778_s10 }
 0x1da   : > { %v564_v34 = vpop.permute.xlu0 %563  ;;  %v572_v35 = vpop.permute.xlu1 %571 }
 0x1de   : > { %v556_v36 = vpop.permute.xlu0 %555  ;;  %v574_v37 = vpop.permute.xlu1 %573 }
 0x1df   : > { %v575_v40 = vsel %vm413_vm1, %v572_v35, %v574_v37  ;;  %v576_v41 = vsel %vm413_vm1, %v574_v37, %v572_v35 }
 0x1e0   : > { %v577_v42 = vmul.f32 %v575_v40, %v892_v16  ;;  %v578_v43 = vmul.f32 %v576_v41, %v886_v14 }
 0x1e2   : > { %v548_v44 = vpop.permute.xlu0 %547  ;;  %v566_v45 = vpop.permute.xlu1 %565  ;;  %604 = vmatprep.subr.mxu1 %v578_v43 }
 0x1e3   : > { %v567_v46 = vsel %vm391_vm0, %v564_v34, %v566_v45  ;;  %v568_v49 = vsel %vm391_vm0, %v566_v45, %v564_v34  ;;  %605 = vmatpush1.msra.mxu1 %v577_v42 }
 0x1e4   : > { %v569_v50 = vmul.f32 %v567_v46, %v895_v17  ;;  %v570_v51 = vmul.f32 %v568_v49, %v898_v18 }
 0x1e6   : > { %v558_v52 = vpop.permute.xlu1 %557  ;;  %606 = vmatprep.subr.mxu1 %v570_v51  ;;  %v540_v53 = vpop.permute.xlu0 %539 }
 0x1e7   : > { %v559_v16 = vsel %vm369_vm2, %v556_v36, %v558_v52  ;;  %v560_v14 = vsel %vm369_vm2, %v558_v52, %v556_v36  ;;  %607 = vmatpush1.msra.mxu1 %v569_v50 }
 0x1e8   : > { %v561_v54 = vmul.f32 %v559_v16, %v908_v24  ;;  %v562_v55 = vmul.f32 %v560_v14, %v914_v27 }
 0x1ea   : > { %v550_v58 = vpop.permute.xlu1 %549  ;;  %608 = vmatprep.subr.mxu1 %v562_v55  ;;  %v532_v61 = vpop.permute.xlu0 %531 }
 0x1eb   : > { %v551_v17 = vsel %vm347_vm3, %v548_v44, %v550_v58  ;;  %v552_v18 = vsel %vm347_vm3, %v550_v58, %v548_v44  ;;  %609 = vmatpush1.msra.mxu1 %v561_v54 }
 0x1ec   : > { %v553_v59 = vmul.f32 %v551_v17, %v930_v38  ;;  %v554_v60 = vmul.f32 %v552_v18, %v933_v39 }
 0x1ee   : > { %v542_v62 = vpop.permute.xlu1 %541  ;;  %610 = vmatprep.subr.mxu1 %v554_v60  ;;  %v524_v4 = vpop.permute.xlu0 %523 }
 0x1ef   : > { %v543_v24 = vsel %vm325_vm4, %v540_v53, %v542_v62  ;;  %v544_v27 = vsel %vm325_vm4, %v542_v62, %v540_v53  ;;  %611 = vmatpush1.msra.mxu1 %v553_v59 }
 0x1f0   : > { %v545_v63 = vmul.f32 %v544_v27, %v946_v47  ;;  %v546_v0 = vmul.f32 %v543_v24, %v949_v48  ;;  %612 = vmatprep.subr.mxu1 %v514_v32 }
 0x1f1   : > { %613 = vmatpush1.msra.mxu1 %v513_v30 }
 0x1f2   : > { %v534_v3 = vpop.permute.xlu1 %533  ;;  %614 = vmatprep.subr.mxu1 %v546_v0  ;;  %v516_v19 = vpop.permute.xlu0 %515 }
 0x1f3   : > { %v535_v38 = vsel %vm303_vm5, %v532_v61, %v534_v3  ;;  %v536_v39 = vsel %vm303_vm5, %v534_v3, %v532_v61  ;;  %615 = vmatpush1.msra.mxu1 %v545_v63 }
 0x1f4   : > { %v537_v5 = vmul.f32 %v536_v39, %v963_v56  ;;  %v538_v6 = vmul.f32 %v535_v38, %v966_v57 }
 0x1f6   : > { %v526_v10 = vpop.permute.xlu1 %525  ;;  %616 = vmatprep.subr.mxu1 %v538_v6 }
 0x1f7   : > { %v527_v47 = vsel %vm281_vm6, %v524_v4, %v526_v10  ;;  %v528_v48 = vsel %vm281_vm6, %v526_v10, %v524_v4  ;;  %617 = vmatpush1.msra.mxu1 %v537_v5 }
 0x1f8   : > { %v529_v11 = vmul.f32 %v528_v48, %v980_v1  ;;  %v530_v12 = vmul.f32 %v527_v47, %v983_v2  ;;  %v579_v1 = vld [vmem:[%s1091_s3] sm:$0xff] }
 0x1fa   : > { %v518_v20 = vpop.permute.xlu1 %517  ;;  %618 = vmatprep.subr.mxu1 %v530_v12 }
 0x1fb   : > { %v519_v56 = vsel %vm260_vm7, %v516_v19, %v518_v20  ;;  %v520_v57 = vsel %vm260_vm7, %v518_v20, %v516_v19  ;;  %619 = vmatpush1.msra.mxu1 %v529_v11 }
 0x1fc   : > { %v521_v21 = vmul.f32 %v520_v57, %v996_v13  ;;  %v522_v22 = vmul.f32 %v519_v56, %v999_v15 }
 0x1fe   : > { %620 = vmatprep.subr.mxu1 %v522_v22 }
 0x1ff   : > { %621 = vmatpush1.msra.mxu1 %v521_v21  ;;  %v584_v2 = vpop.permute.xlu0 %583 }
 0x200   : > { %737 = vmatmul.mubr.msk.f32.vlgmr.msra.gmra.mxu1 %vm586_vm9, %v579_v1 }
 0x2c0   : > { %v656_v23 = vpop.f32.mrf.mxu1 }
 0x2c1   : > { %v657_v25 = vadd.f32 %v656_v23, %v584_v2 }
 0x2c2   : > { %v658_v7 = vpop.f32.mrf.mxu1 }
 0x2c3   : > { %v661_v13 = vmax.f32 %v657_v25, 0.0  ;;  %v659_v8 = vadd.f32 %v658_v7, %v584_v2 }
 0x2c5   : > { %663 = vst [vmem:[%s251_s8] sm:$0xff] %v661_v13  ;;  %v662_v15 = vmax.f32 %v659_v8, 0.0 }
 0x2c7   : > { %664 = vst [vmem:[%s251_s8 + $0x8] sm:$0xff] %v662_v15 }
 0x2c8 PF: > { %s16_s21 = sadd.s32 1, %s767_s21  }
 0x2c9   : > { %p13_p4 = scmp.ge.s32.totalorder %s16_s21, 4  }
 0x2cb   :  { %15 = sbr.rel (!%p13_p4) target bundleno = 1 (0x1), region = 81 }

</bundles_post_ra>
